<compile_context>
chip_gen: v5e
topology: v5e:2x2
jax: 0.10.0
libtpu: 0.0.40
codegen_flags: <defaults>
</compile_context>

<pallas_src>
import functools

import jax
import jax.numpy as jnp
from jax.experimental import pallas as pl
from jax.experimental.pallas import tpu as pltpu

THRESHOLD = 0.5
NEG_POS_RATIO = 3
ALPHA = 1.0


def _round_up(x, m):
    return ((x + m - 1) // m) * m


def _pick_tile(p_pad, max_tile=512):
    """Largest multiple-of-128 tile <= max_tile that divides p_pad."""
    t = min(max_tile, p_pad)
    while p_pad % t:
        t -= 128
    return t


# ----------------------------------------------------------------------------
# Pallas kernel 1: batched Jaccard (IoU) overlap, lane-dense over priors.
#   boxes_ref  : (1, N_pad, 4)   one image's (padded) GT boxes, xy format
#   priors_ref : (4, TPI)        priors transposed once in the wrapper
#   out_ref    : (1, N_pad, TPI)
# ----------------------------------------------------------------------------
def _iou_kernel(boxes_ref, priors_t_ref, out_ref):
    b = boxes_ref[0]                                   # (N_pad, 4)
    p = priors_t_ref[...]                              # (4, TPI)
    bx1, by1, bx2, by2 = b[:, 0:1], b[:, 1:2], b[:, 2:3], b[:, 3:4]     # (N,1)
    px1, py1, px2, py2 = p[0:1, :], p[1:2, :], p[2:3, :], p[3:4, :]     # (1,T)
    ix1 = jnp.maximum(bx1, px1)
    iy1 = jnp.maximum(by1, py1)
    ix2 = jnp.minimum(bx2, px2)
    iy2 = jnp.minimum(by2, py2)
    inter = jnp.maximum(ix2 - ix1, 0.0) * jnp.maximum(iy2 - iy1, 0.0)   # (N,T)
    area_b = (bx2 - bx1) * (by2 - by1)                                  # (N,1)
    area_p = (px2 - px1) * (py2 - py1)                                  # (1,T)
    out_ref[...] = (inter / (area_b + area_p - inter))[None]


# ----------------------------------------------------------------------------
# Pallas kernel 2: fused cross-entropy (lane axis = priors) + masked L1 box
# loss + positive-CE sum + positive count.  Grid = (B, P_pad // TP).
#   scores_ref : (1, C, TP)   class logits (any float dtype, cast in-kernel)
#   labels_ref : (1, 1, TP)   matched class per prior (0 = background)
#   locs_ref   : (1, 4, TP)   predicted box offsets
#   tb_ref     : (1, 4, TP)   encoded target box offsets
# Outputs:
#   ce_neg_ref : (1, 1, TP)   CE with positives / padded columns zeroed
#   posce_ref  : (1, 1, 128)  accumulated sum of CE over positive priors
#   l1_ref     : (1, 1, 128)  accumulated sum of |locs - tb| over positives
#   npos_ref   : (1, 1, 128)  accumulated number of positive priors
# ----------------------------------------------------------------------------
def _fused_ce_l1_kernel(scores_ref, labels_ref, locs_ref, tb_ref,
                        ce_neg_ref, posce_ref, l1_ref, npos_ref,
                        *, n_real_priors):
    pt = pl.program_id(1)

    @pl.when(pt == 0)
    def _init():
        posce_ref[...] = jnp.zeros_like(posce_ref)
        l1_ref[...] = jnp.zeros_like(l1_ref)
        npos_ref[...] = jnp.zeros_like(npos_ref)

    s = scores_ref[0].astype(jnp.float32)              # (C, TP)
    lbl = labels_ref[0]                                # (1, TP) int32
    c, tp = s.shape

    # Cross-entropy: logsumexp over the class (sublane) axis minus target logit.
    m = jnp.max(s, axis=0, keepdims=True)                              # (1,TP)
    lse = jnp.log(jnp.sum(jnp.exp(s - m), axis=0, keepdims=True)) + m
    cls_ids = jax.lax.broadcasted_iota(jnp.int32, (c, tp), 0)
    tgt = jnp.sum(jnp.where(cls_ids == lbl, s, 0.0), axis=0, keepdims=True)
    ce = lse - tgt                                                     # (1,TP)

    pos = lbl != 0
    posf = pos.astype(jnp.float32)

    # Mask out the priors added as lane padding (columns >= n_real_priors).
    col = jax.lax.broadcasted_iota(jnp.int32, (1, tp), 1) + pt * tp
    valid = col < n_real_priors

    # Negative-class loss (positives & padding zeroed) -> hard-neg mining.
    ce_neg_ref[...] = jnp.where(jnp.logical_and(valid, jnp.logical_not(pos)),
                                ce, 0.0)[None]

    # Fused reductions (no second HBM round-trip over locs / true_boxes / ce).
    posce_ref[...] += jnp.sum(ce * posf)
    npos_ref[...] += jnp.sum(posf)
    l1 = jnp.abs(locs_ref[0].astype(jnp.float32) - tb_ref[0])          # (4,TP)
    l1_ref[...] += jnp.sum(l1 * posf)


# ----------------------------------------------------------------------------
# Plain-JAX glue: SSD box-coordinate helpers.
# ----------------------------------------------------------------------------
def cxcy_to_xy(cxcy):
    return jnp.concatenate([cxcy[:, :2] - cxcy[:, 2:] / 2.0,
                            cxcy[:, :2] + cxcy[:, 2:] / 2.0], axis=1)


def xy_to_cxcy(xy):
    return jnp.concatenate([(xy[:, :2] + xy[:, 2:]) / 2.0,
                            xy[:, 2:] - xy[:, :2]], axis=1)


def cxcy_to_gcxgcy(cxcy, priors_cxcy):
    return jnp.concatenate(
        [(cxcy[:, :2] - priors_cxcy[:, :2]) / (priors_cxcy[:, 2:] / 10.0),
         jnp.log(cxcy[:, 2:] / priors_cxcy[:, 2:]) * 5.0], axis=1)


def pad_targets(boxes_list, labels_list):
    """Pack ragged per-image GT lists into padded (B, N_max, ...) arrays."""
    n_max = max(1, max(int(b.shape[0]) for b in boxes_list))
    boxes = jnp.stack([jnp.pad(jnp.asarray(b, jnp.float32),
                               ((0, n_max - b.shape[0]), (0, 0)))
                       for b in boxes_list])
    labels = jnp.stack([jnp.pad(jnp.asarray(l, jnp.int32),
                                (0, n_max - l.shape[0]))
                        for l in labels_list])
    n_obj = jnp.array([int(b.shape[0]) for b in boxes_list], jnp.int32)
    return boxes, labels, n_obj


# ----------------------------------------------------------------------------
# Full MultiBox loss (jittable: no per-image Python loop, padded GT).
# ----------------------------------------------------------------------------
@functools.partial(jax.jit,
                   static_argnames=("threshold", "neg_pos_ratio", "alpha",
                                    "max_hard_negatives"))
def multibox_loss(predicted_locs, predicted_scores, boxes, labels, n_objects,
                  priors_cxcy, *, threshold=THRESHOLD,
                  neg_pos_ratio=NEG_POS_RATIO, alpha=ALPHA,
                  max_hard_negatives=None):
    B, P, _ = predicted_locs.shape
    C = predicted_scores.shape[2]
    N = boxes.shape[1]
    assert P == priors_cxcy.shape[0] == predicted_scores.shape[1]

    N_pad = _round_up(max(N, 1), 8)                    # sublane-aligned objects
    P_pad = _round_up(P, 128)                          # lane-dense priors

    priors_cxcy = priors_cxcy.astype(jnp.float32)
    priors_xy = cxcy_to_xy(priors_cxcy)                # (P, 4), computed once

    pad_box = jnp.array([0.0, 0.0, 1.0, 1.0], jnp.float32)   # finite dummy box

    # Pad / sanitize GT boxes and labels (invalid rows -> dummy box, label 0).
    boxes_f = boxes.astype(jnp.float32)
    labels_i = labels.astype(jnp.int32)
    if N_pad > N:
        boxes_f = jnp.concatenate(
            [boxes_f, jnp.broadcast_to(pad_box, (B, N_pad - N, 4))], axis=1)
        labels_i = jnp.concatenate(
            [labels_i, jnp.zeros((B, N_pad - N), jnp.int32)], axis=1)
    obj_ids = jnp.arange(N_pad, dtype=jnp.int32)
    valid_obj = obj_ids[None, :] < n_objects[:, None]          # (B, N_pad)
    boxes_f = jnp.where(valid_obj[:, :, None], boxes_f, pad_box)
    labels_i = jnp.where(valid_obj, labels_i, 0)

    # Priors padded to P_pad with dummy unit boxes (pad columns discarded).
    if P_pad > P:
        priors_xy_p = jnp.concatenate(
            [priors_xy, jnp.broadcast_to(pad_box, (P_pad - P, 4))], axis=0)
    else:
        priors_xy_p = priors_xy
    priors_t = priors_xy_p.T                                    # (4, P_pad)

    # ---- Kernel 1: batched IoU (one launch for the whole batch) -----------
    TPI = _pick_tile(P_pad)
    overlap = pl.pallas_call(
        _iou_kernel,
        grid=(B, P_pad // TPI),
        in_specs=[pl.BlockSpec((1, N_pad, 4), lambda b, t: (b, 0, 0)),
                  pl.BlockSpec((4, TPI), lambda b, t: (0, t))],
        out_specs=pl.BlockSpec((1, N_pad, TPI), lambda b, t: (b, 0, t)),
        out_shape=jax.ShapeDtypeStruct((B, N_pad, P_pad), jnp.float32),
        compiler_params=pltpu.CompilerParams(
            dimension_semantics=("parallel", "parallel")),
    )(boxes_f, priors_t)
    overlap = overlap[:, :, :P]
    overlap = jnp.where(valid_obj[:, :, None], overlap, -1.0)   # ignore pads

    # ---- Matching (plain JAX: small argmax / gather / scatter work) -------
    def _match_one(ovl, boxes_b, labels_b, n_obj):
        prior_max = jnp.max(ovl, axis=0)                        # (P,)
        obj_for_prior = jnp.argmax(ovl, axis=0).astype(jnp.int32)
        prior_for_obj = jnp.argmax(ovl, axis=1).astype(jnp.int32)
        valid = obj_ids < n_obj
        tgt = jnp.where(valid, prior_for_obj, P)   # OOB index -> update dropped
        obj_for_prior = obj_for_prior.at[tgt].set(obj_ids, mode="drop")
        prior_max = prior_max.at[tgt].set(threshold + 0.1, mode="drop")
        label_for_prior = labels_b[obj_for_prior]
        label_for_prior = jnp.where(prior_max < threshold, 0, label_for_prior)
        matched_xy = boxes_b[obj_for_prior]                     # (P, 4)
        tb = cxcy_to_gcxgcy(xy_to_cxcy(matched_xy), priors_cxcy)
        return tb, label_for_prior

    true_boxes, true_classes = jax.vmap(_match_one)(
        overlap, boxes_f, labels_i, n_objects)                  # (B,P,4),(B,P)

    # ---- Lane-dense relayout for the fused CE/L1 kernel --------------------
    def _pad_last(x):
        pad = P_pad - x.shape[-1]
        if pad == 0:
            return x
        return jnp.pad(x, [(0, 0)] * (x.ndim - 1) + [(0, pad)])

    # Keep input dtype (e.g. bf16) across the pallas boundary; cast in-kernel.
    scores_t = _pad_last(jnp.transpose(predicted_scores, (0, 2, 1)))  # (B,C,Pp)
    locs_t = _pad_last(jnp.transpose(predicted_locs, (0, 2, 1)))      # (B,4,Pp)
    tb_t = _pad_last(jnp.transpose(true_boxes, (0, 2, 1)).astype(jnp.float32))
    labels_t = _pad_last(true_classes.astype(jnp.int32)[:, None, :])  # (B,1,Pp)

    # ---- Kernel 2: fused CE + L1 + positive sums, tiled over priors --------
    TP = _pick_tile(P_pad)
    fused = functools.partial(_fused_ce_l1_kernel, n_real_priors=P)
    ce_neg, pos_ce, l1_sum, n_pos = pl.pallas_call(
        fused,
        grid=(B, P_pad // TP),
        in_specs=[pl.BlockSpec((1, C, TP), lambda b, t: (b, 0, t)),
                  pl.BlockSpec((1, 1, TP), lambda b, t: (b, 0, t)),
                  pl.BlockSpec((1, 4, TP), lambda b, t: (b, 0, t)),
                  pl.BlockSpec((1, 4, TP), lambda b, t: (b, 0, t))],
        out_specs=[pl.BlockSpec((1, 1, TP), lambda b, t: (b, 0, t)),
                   pl.BlockSpec((1, 1, 128), lambda b, t: (b, 0, 0)),
                   pl.BlockSpec((1, 1, 128), lambda b, t: (b, 0, 0)),
                   pl.BlockSpec((1, 1, 128), lambda b, t: (b, 0, 0))],
        out_shape=[jax.ShapeDtypeStruct((B, 1, P_pad), jnp.float32),
                   jax.ShapeDtypeStruct((B, 1, 128), jnp.float32),
                   jax.ShapeDtypeStruct((B, 1, 128), jnp.float32),
                   jax.ShapeDtypeStruct((B, 1, 128), jnp.float32)],
        compiler_params=pltpu.CompilerParams(
            dimension_semantics=("parallel", "arbitrary")),
    )(scores_t, labels_t, locs_t, tb_t)

    ce_neg = ce_neg[:, 0, :P]                          # (B, P) lane-dense CE
    pos_ce_sum = jnp.sum(pos_ce[:, 0, 0])
    l1_total = jnp.sum(l1_sum[:, 0, 0])
    n_pos_row = n_pos[:, 0, 0]                         # (B,)
    n_pos_total = jnp.sum(n_pos_row)
    # Guard zero positives (PyTorch would produce NaN here).
    denom = jnp.maximum(n_pos_total, 1.0)

    # Hard-negative mining: top-k descending replaces the full per-row sort.
    # TODO(synk): no Pallas sort/top-k primitive on TPU; jax.lax.top_k in XLA.
    k = P if max_hard_negatives is None else min(int(max_hard_negatives), P)
    neg_sorted, _ = jax.lax.top_k(ce_neg, k)           # (B, k) descending
    ranks = jnp.arange(k, dtype=jnp.float32)[None, :]
    hard = ranks < (neg_pos_ratio * n_pos_row)[:, None]
    hard_neg_sum = jnp.sum(jnp.where(hard, neg_sorted, 0.0))

    box_loss = l1_total / (4.0 * denom)                # nn.L1Loss() mean
    class_loss = (hard_neg_sum + pos_ce_sum) / denom
    return class_loss + alpha * box_loss


if __name__ == "__main__":
    key = jax.random.PRNGKey(0)
    B, P, C, N_OBJ = 2, 64, 8, 3

    k_pr_c, k_pr_s, k_loc, k_sc, k_bc, k_bs, k_lab = jax.random.split(key, 7)

    # Deterministic synthetic priors (center format, inside [0, 1]).
    prior_centers = jax.random.uniform(k_pr_c, (P, 2), minval=0.1, maxval=0.9)
    prior_sizes = jax.random.uniform(k_pr_s, (P, 2), minval=0.05, maxval=0.3)
    priors_cxcy = jnp.concatenate([prior_centers, prior_sizes], axis=1)

    # Predictions.
    predicted_locs = jax.random.normal(k_loc, (B, P, 4), dtype=jnp.float32)
    predicted_scores = jax.random.normal(k_sc, (B, P, C), dtype=jnp.float32)

    # Ground-truth boxes (xy format) and labels per image (ragged: 3 and 2).
    gt_centers = jax.random.uniform(k_bc, (B, N_OBJ, 2), minval=0.2, maxval=0.8)
    gt_sizes = jax.random.uniform(k_bs, (B, N_OBJ, 2), minval=0.1, maxval=0.3)
    gt_xy = jnp.concatenate([gt_centers - gt_sizes / 2.0,
                             gt_centers + gt_sizes / 2.0], axis=2)
    gt_labels = jax.random.randint(k_lab, (B, N_OBJ), 1, C, dtype=jnp.int32)

    boxes_list = [gt_xy[0], gt_xy[1][:2]]
    labels_list = [gt_labels[0], gt_labels[1][:2]]
    boxes, labels, n_objects = pad_targets(boxes_list, labels_list)

    loss = multibox_loss(predicted_locs, predicted_scores, boxes, labels,
                         n_objects, priors_cxcy)
    jax.block_until_ready(loss)
    assert jnp.isfinite(loss), loss
    print("KERNEL_OK")
</pallas_src>

<mosaic_0001>
module attributes {stable_mosaic.version = 11 : i64} {
  func.func @_iou_kernel(%arg0: i32, %arg1: i32, %arg2: memref<1x8x4xf32, #tpu.memory_space<vmem>>, %arg3: memref<4x128xf32, #tpu.memory_space<vmem>>, %arg4: memref<1x8x128xf32, #tpu.memory_space<vmem>>) attributes {dimension_semantics = [#tpu.dimension_semantics<parallel>, #tpu.dimension_semantics<parallel>], iteration_bounds = array<i64: 2, 1>, scalar_prefetch = 0 : i64, scratch_operands = 0 : i64, tpu.core_type = #tpu.core_type<tc>, window_params = [{transform_indices = @transform_0, window_bounds = array<i64: 1, 8, 4>}, {transform_indices = @transform_1, window_bounds = array<i64: 4, 128>}, {transform_indices = @transform_2, window_bounds = array<i64: 1, 8, 128>}]} {
    %c0 = arith.constant 0 : index
    %c0_0 = arith.constant 0 : index
    %c0_1 = arith.constant 0 : index
    %0 = vector.load %arg2[%c0, %c0_0, %c0_1] : memref<1x8x4xf32, #tpu.memory_space<vmem>>, vector<1x8x4xf32>
    %1 = vector.shape_cast %0 : vector<1x8x4xf32> to vector<8x4xf32>
    %c0_2 = arith.constant 0 : index
    %c0_3 = arith.constant 0 : index
    %2 = vector.load %arg3[%c0_2, %c0_3] : memref<4x128xf32, #tpu.memory_space<vmem>>, vector<4x128xf32>
    %3 = vector.extract_strided_slice %1 {offsets = [0, 0], sizes = [8, 1], strides = [1, 1]} : vector<8x4xf32> to vector<8x1xf32>
    %4 = vector.extract_strided_slice %1 {offsets = [0, 1], sizes = [8, 1], strides = [1, 1]} : vector<8x4xf32> to vector<8x1xf32>
    %5 = vector.extract_strided_slice %1 {offsets = [0, 2], sizes = [8, 1], strides = [1, 1]} : vector<8x4xf32> to vector<8x1xf32>
    %6 = vector.extract_strided_slice %1 {offsets = [0, 3], sizes = [8, 1], strides = [1, 1]} : vector<8x4xf32> to vector<8x1xf32>
    %7 = vector.extract_strided_slice %2 {offsets = [0, 0], sizes = [1, 128], strides = [1, 1]} : vector<4x128xf32> to vector<1x128xf32>
    %8 = vector.extract_strided_slice %2 {offsets = [1, 0], sizes = [1, 128], strides = [1, 1]} : vector<4x128xf32> to vector<1x128xf32>
    %9 = vector.extract_strided_slice %2 {offsets = [2, 0], sizes = [1, 128], strides = [1, 1]} : vector<4x128xf32> to vector<1x128xf32>
    %10 = vector.extract_strided_slice %2 {offsets = [3, 0], sizes = [1, 128], strides = [1, 1]} : vector<4x128xf32> to vector<1x128xf32>
    %11 = vector.broadcast %3 : vector<8x1xf32> to vector<8x128xf32>
    %12 = vector.broadcast %7 : vector<1x128xf32> to vector<8x128xf32>
    %13 = arith.maximumf %11, %12 : vector<8x128xf32>
    %14 = vector.broadcast %4 : vector<8x1xf32> to vector<8x128xf32>
    %15 = vector.broadcast %8 : vector<1x128xf32> to vector<8x128xf32>
    %16 = arith.maximumf %14, %15 : vector<8x128xf32>
    %17 = vector.broadcast %5 : vector<8x1xf32> to vector<8x128xf32>
    %18 = vector.broadcast %9 : vector<1x128xf32> to vector<8x128xf32>
    %19 = arith.minimumf %17, %18 : vector<8x128xf32>
    %20 = vector.broadcast %6 : vector<8x1xf32> to vector<8x128xf32>
    %21 = vector.broadcast %10 : vector<1x128xf32> to vector<8x128xf32>
    %22 = arith.minimumf %20, %21 : vector<8x128xf32>
    %23 = arith.subf %19, %13 : vector<8x128xf32>
    %cst = arith.constant 0.000000e+00 : f32
    %24 = vector.broadcast %cst : f32 to vector<8x128xf32>
    %25 = arith.maximumf %23, %24 : vector<8x128xf32>
    %26 = arith.subf %22, %16 : vector<8x128xf32>
    %cst_4 = arith.constant 0.000000e+00 : f32
    %27 = vector.broadcast %cst_4 : f32 to vector<8x128xf32>
    %28 = arith.maximumf %26, %27 : vector<8x128xf32>
    %29 = arith.mulf %25, %28 : vector<8x128xf32>
    %30 = arith.subf %5, %3 : vector<8x1xf32>
    %31 = arith.subf %6, %4 : vector<8x1xf32>
    %32 = arith.mulf %30, %31 : vector<8x1xf32>
    %33 = arith.subf %9, %7 : vector<1x128xf32>
    %34 = arith.subf %10, %8 : vector<1x128xf32>
    %35 = arith.mulf %33, %34 : vector<1x128xf32>
    %36 = vector.broadcast %32 : vector<8x1xf32> to vector<8x128xf32>
    %37 = vector.broadcast %35 : vector<1x128xf32> to vector<8x128xf32>
    %38 = arith.addf %36, %37 : vector<8x128xf32>
    %39 = arith.subf %38, %29 : vector<8x128xf32>
    %40 = arith.divf %29, %39 : vector<8x128xf32>
    %41 = vector.shape_cast %40 : vector<8x128xf32> to vector<1x8x128xf32>
    %c0_5 = arith.constant 0 : index
    %c0_6 = arith.constant 0 : index
    %c0_7 = arith.constant 0 : index
    %42 = vector.load %arg4[%c0_5, %c0_6, %c0_7] : memref<1x8x128xf32, #tpu.memory_space<vmem>>, vector<1x8x128xf32>
    tpu.vector_store %arg4[%c0_5, %c0_6, %c0_7], %41 {strides = array<i32>} : memref<1x8x128xf32, #tpu.memory_space<vmem>>, vector<1x8x128xf32>,
    return
  }
  func.func @transform_0(%arg0: i32, %arg1: i32) -> (i32, i32, i32) {
    %c0_i32 = arith.constant 0 : i32
    %c0_i32_0 = arith.constant 0 : i32
    %c0_i32_1 = arith.constant 0 : i32
    return %arg0, %c0_i32, %c0_i32_0 : i32, i32, i32
  }
  func.func @transform_1(%arg0: i32, %arg1: i32) -> (i32, i32) {
    %c0_i32 = arith.constant 0 : i32
    %c0_i32_0 = arith.constant 0 : i32
    return %c0_i32, %arg1 : i32, i32
  }
  func.func @transform_2(%arg0: i32, %arg1: i32) -> (i32, i32, i32) {
    %c0_i32 = arith.constant 0 : i32
    %c0_i32_0 = arith.constant 0 : i32
    return %arg0, %c0_i32, %arg1 : i32, i32, i32
  }
}

module attributes {stable_mosaic.version = 11 : i64} {
  func.func @_fused_ce_l1_kernel(%arg0: i32, %arg1: i32, %arg2: memref<1x8x128xf32, #tpu.memory_space<vmem>>, %arg3: memref<1x1x128xi32, #tpu.memory_space<vmem>>, %arg4: memref<1x4x128xf32, #tpu.memory_space<vmem>>, %arg5: memref<1x4x128xf32, #tpu.memory_space<vmem>>, %arg6: memref<1x1x128xf32, #tpu.memory_space<vmem>>, %arg7: memref<1x1x128xf32, #tpu.memory_space<vmem>>, %arg8: memref<1x1x128xf32, #tpu.memory_space<vmem>>, %arg9: memref<1x1x128xf32, #tpu.memory_space<vmem>>) attributes {dimension_semantics = [#tpu.dimension_semantics<parallel>, #tpu.dimension_semantics<arbitrary>], iteration_bounds = array<i64: 2, 1>, scalar_prefetch = 0 : i64, scratch_operands = 0 : i64, tpu.core_type = #tpu.core_type<tc>, window_params = [{transform_indices = @transform_0, window_bounds = array<i64: 1, 8, 128>}, {transform_indices = @transform_1, window_bounds = array<i64: 1, 1, 128>}, {transform_indices = @transform_2, window_bounds = array<i64: 1, 4, 128>}, {transform_indices = @transform_3, window_bounds = array<i64: 1, 4, 128>}, {transform_indices = @transform_4, window_bounds = array<i64: 1, 1, 128>}, {transform_indices = @transform_5, window_bounds = array<i64: 1, 1, 128>}, {transform_indices = @transform_6, window_bounds = array<i64: 1, 1, 128>}, {transform_indices = @transform_7, window_bounds = array<i64: 1, 1, 128>}]} {
    %c0_i32 = arith.constant 0 : i32
    %0 = arith.cmpi eq, %arg1, %c0_i32 : i32
    %1 = arith.extui %0 : i1 to i32
    %c0_i32_0 = arith.constant 0 : i32
    %2 = arith.cmpi ne, %1, %c0_i32_0 : i32
    scf.if %2 {
      %cst_42 = arith.constant 0.000000e+00 : f32
      %73 = vector.broadcast %cst_42 : f32 to vector<1x1x128xf32>
      %c0_43 = arith.constant 0 : index
      %c0_44 = arith.constant 0 : index
      %c0_45 = arith.constant 0 : index
      %74 = vector.load %arg7[%c0_43, %c0_44, %c0_45] : memref<1x1x128xf32, #tpu.memory_space<vmem>>, vector<1x1x128xf32>
      tpu.vector_store %arg7[%c0_43, %c0_44, %c0_45], %73 {strides = array<i32>} : memref<1x1x128xf32, #tpu.memory_space<vmem>>, vector<1x1x128xf32>,
      %cst_46 = arith.constant 0.000000e+00 : f32
      %75 = vector.broadcast %cst_46 : f32 to vector<1x1x128xf32>
      %c0_47 = arith.constant 0 : index
      %c0_48 = arith.constant 0 : index
      %c0_49 = arith.constant 0 : index
      %76 = vector.load %arg8[%c0_47, %c0_48, %c0_49] : memref<1x1x128xf32, #tpu.memory_space<vmem>>, vector<1x1x128xf32>
      tpu.vector_store %arg8[%c0_47, %c0_48, %c0_49], %75 {strides = array<i32>} : memref<1x1x128xf32, #tpu.memory_space<vmem>>, vector<1x1x128xf32>,
      %cst_50 = arith.constant 0.000000e+00 : f32
      %77 = vector.broadcast %cst_50 : f32 to vector<1x1x128xf32>
      %c0_51 = arith.constant 0 : index
      %c0_52 = arith.constant 0 : index
      %c0_53 = arith.constant 0 : index
      %78 = vector.load %arg9[%c0_51, %c0_52, %c0_53] : memref<1x1x128xf32, #tpu.memory_space<vmem>>, vector<1x1x128xf32>
      tpu.vector_store %arg9[%c0_51, %c0_52, %c0_53], %77 {strides = array<i32>} : memref<1x1x128xf32, #tpu.memory_space<vmem>>, vector<1x1x128xf32>,
    } else {
    }
    %c0 = arith.constant 0 : index
    %c0_1 = arith.constant 0 : index
    %c0_2 = arith.constant 0 : index
    %3 = vector.load %arg2[%c0, %c0_1, %c0_2] : memref<1x8x128xf32, #tpu.memory_space<vmem>>, vector<1x8x128xf32>
    %4 = vector.shape_cast %3 : vector<1x8x128xf32> to vector<8x128xf32>
    %c0_3 = arith.constant 0 : index
    %c0_4 = arith.constant 0 : index
    %c0_5 = arith.constant 0 : index
    %5 = vector.load %arg3[%c0_3, %c0_4, %c0_5] : memref<1x1x128xi32, #tpu.memory_space<vmem>>, vector<1x1x128xi32>
    %6 = vector.shape_cast %5 : vector<1x1x128xi32> to vector<1x128xi32>
    %cst = arith.constant dense<0xFF800000> : vector<128xf32>
    %7 = vector.multi_reduction <maximumf>, %4, %cst [0] : vector<8x128xf32> to vector<128xf32>
    %8 = vector.shape_cast %7 : vector<128xf32> to vector<1x128xf32>
    %9 = vector.broadcast %8 : vector<1x128xf32> to vector<8x128xf32>
    %10 = arith.subf %4, %9 : vector<8x128xf32>
    %11 = math.exp %10 : vector<8x128xf32>
    %cst_6 = arith.constant dense<0.000000e+00> : vector<128xf32>
    %12 = vector.multi_reduction <add>, %11, %cst_6 [0] : vector<8x128xf32> to vector<128xf32>
    %13 = vector.shape_cast %12 : vector<128xf32> to vector<1x128xf32>
    %14 = math.log %13 : vector<1x128xf32>
    %15 = arith.addf %14, %8 : vector<1x128xf32>
    %16 = tpu.iota {dimensions = array<i32: 0>} : vector<8x128xi32>
    %17 = vector.broadcast %6 : vector<1x128xi32> to vector<8x128xi32>
    %18 = arith.cmpi eq, %16, %17 : vector<8x128xi32>
    %cst_7 = arith.constant 0.000000e+00 : f32
    %19 = vector.broadcast %cst_7 : f32 to vector<8x128xf32>
    %20 = arith.select %18, %4, %19 : vector<8x128xi1>, vector<8x128xf32>
    %cst_8 = arith.constant dense<0.000000e+00> : vector<128xf32>
    %21 = vector.multi_reduction <add>, %20, %cst_8 [0] : vector<8x128xf32> to vector<128xf32>
    %22 = vector.shape_cast %21 : vector<128xf32> to vector<1x128xf32>
    %23 = arith.subf %15, %22 : vector<1x128xf32>
    %c0_i32_9 = arith.constant 0 : i32
    %24 = vector.broadcast %c0_i32_9 : i32 to vector<1x128xi32>
    %25 = arith.cmpi ne, %6, %24 : vector<1x128xi32>
    %26 = arith.extui %25 : vector<1x128xi1> to vector<1x128xi32>
    %27 = arith.sitofp %26 : vector<1x128xi32> to vector<1x128xf32>
    %28 = tpu.iota {dimensions = array<i32: 1>} : vector<1x128xi32>
    %c128_i32 = arith.constant 128 : i32
    %29 = arith.muli %arg1, %c128_i32 : i32
    %30 = vector.broadcast %29 : i32 to vector<1x128xi32>
    %31 = arith.addi %28, %30 : vector<1x128xi32>
    %c64_i32 = arith.constant 64 : i32
    %32 = vector.broadcast %c64_i32 : i32 to vector<1x128xi32>
    %33 = arith.cmpi slt, %31, %32 : vector<1x128xi32>
    %cst_10 = arith.constant dense<true> : vector<1x128xi1>
    %34 = arith.xori %25, %cst_10 : vector<1x128xi1>
    %35 = arith.andi %33, %34 : vector<1x128xi1>
    %cst_11 = arith.constant 0.000000e+00 : f32
    %36 = vector.broadcast %cst_11 : f32 to vector<1x128xf32>
    %37 = arith.select %35, %23, %36 : vector<1x128xi1>, vector<1x128xf32>
    %38 = vector.shape_cast %37 : vector<1x128xf32> to vector<1x1x128xf32>
    %c0_12 = arith.constant 0 : index
    %c0_13 = arith.constant 0 : index
    %c0_14 = arith.constant 0 : index
    %39 = vector.load %arg6[%c0_12, %c0_13, %c0_14] : memref<1x1x128xf32, #tpu.memory_space<vmem>>, vector<1x1x128xf32>
    tpu.vector_store %arg6[%c0_12, %c0_13, %c0_14], %38 {strides = array<i32>} : memref<1x1x128xf32, #tpu.memory_space<vmem>>, vector<1x1x128xf32>,
    %c0_15 = arith.constant 0 : index
    %c0_16 = arith.constant 0 : index
    %c0_17 = arith.constant 0 : index
    %40 = vector.load %arg7[%c0_15, %c0_16, %c0_17] : memref<1x1x128xf32, #tpu.memory_space<vmem>>, vector<1x1x128xf32>
    %41 = arith.mulf %23, %27 : vector<1x128xf32>
    %42 = vector.shape_cast %41 : vector<1x128xf32> to vector<1x1x128xf32>
    %cst_18 = arith.constant dense<0.000000e+00> : vector<1xf32>
    %43 = vector.multi_reduction <add>, %42, %cst_18 [1, 2] : vector<1x1x128xf32> to vector<1xf32>
    %44 = vector.shape_cast %43 : vector<1xf32> to vector<1x1x1xf32>
    %45 = vector.extract %44[0, 0, 0] : f32 from vector<1x1x1xf32>
    %46 = vector.broadcast %45 : f32 to vector<1x1x128xf32>
    %47 = arith.addf %40, %46 : vector<1x1x128xf32>
    %c0_19 = arith.constant 0 : index
    %c0_20 = arith.constant 0 : index
    %c0_21 = arith.constant 0 : index
    %48 = vector.load %arg7[%c0_19, %c0_20, %c0_21] : memref<1x1x128xf32, #tpu.memory_space<vmem>>, vector<1x1x128xf32>
    tpu.vector_store %arg7[%c0_19, %c0_20, %c0_21], %47 {strides = array<i32>} : memref<1x1x128xf32, #tpu.memory_space<vmem>>, vector<1x1x128xf32>,
    %c0_22 = arith.constant 0 : index
    %c0_23 = arith.constant 0 : index
    %c0_24 = arith.constant 0 : index
    %49 = vector.load %arg9[%c0_22, %c0_23, %c0_24] : memref<1x1x128xf32, #tpu.memory_space<vmem>>, vector<1x1x128xf32>
    %50 = vector.shape_cast %27 : vector<1x128xf32> to vector<1x1x128xf32>
    %cst_25 = arith.constant dense<0.000000e+00> : vector<1xf32>
    %51 = vector.multi_reduction <add>, %50, %cst_25 [1, 2] : vector<1x1x128xf32> to vector<1xf32>
    %52 = vector.shape_cast %51 : vector<1xf32> to vector<1x1x1xf32>
    %53 = vector.extract %52[0, 0, 0] : f32 from vector<1x1x1xf32>
    %54 = vector.broadcast %53 : f32 to vector<1x1x128xf32>
    %55 = arith.addf %49, %54 : vector<1x1x128xf32>
    %c0_26 = arith.constant 0 : index
    %c0_27 = arith.constant 0 : index
    %c0_28 = arith.constant 0 : index
    %56 = vector.load %arg9[%c0_26, %c0_27, %c0_28] : memref<1x1x128xf32, #tpu.memory_space<vmem>>, vector<1x1x128xf32>
    tpu.vector_store %arg9[%c0_26, %c0_27, %c0_28], %55 {strides = array<i32>} : memref<1x1x128xf32, #tpu.memory_space<vmem>>, vector<1x1x128xf32>,
    %c0_29 = arith.constant 0 : index
    %c0_30 = arith.constant 0 : index
    %c0_31 = arith.constant 0 : index
    %57 = vector.load %arg4[%c0_29, %c0_30, %c0_31] : memref<1x4x128xf32, #tpu.memory_space<vmem>>, vector<1x4x128xf32>
    %58 = vector.shape_cast %57 : vector<1x4x128xf32> to vector<4x128xf32>
    %c0_32 = arith.constant 0 : index
    %c0_33 = arith.constant 0 : index
    %c0_34 = arith.constant 0 : index
    %59 = vector.load %arg5[%c0_32, %c0_33, %c0_34] : memref<1x4x128xf32, #tpu.memory_space<vmem>>, vector<1x4x128xf32>
    %60 = vector.shape_cast %59 : vector<1x4x128xf32> to vector<4x128xf32>
    %61 = arith.subf %58, %60 : vector<4x128xf32>
    %62 = math.absf %61 : vector<4x128xf32>
    %c0_35 = arith.constant 0 : index
    %c0_36 = arith.constant 0 : index
    %c0_37 = arith.constant 0 : index
    %63 = vector.load %arg8[%c0_35, %c0_36, %c0_37] : memref<1x1x128xf32, #tpu.memory_space<vmem>>, vector<1x1x128xf32>
    %64 = vector.broadcast %27 : vector<1x128xf32> to vector<4x128xf32>
    %65 = arith.mulf %62, %64 : vector<4x128xf32>
    %66 = vector.shape_cast %65 : vector<4x128xf32> to vector<1x4x128xf32>
    %cst_38 = arith.constant dense<0.000000e+00> : vector<1xf32>
    %67 = vector.multi_reduction <add>, %66, %cst_38 [1, 2] : vector<1x4x128xf32> to vector<1xf32>
    %68 = vector.shape_cast %67 : vector<1xf32> to vector<1x1x1xf32>
    %69 = vector.extract %68[0, 0, 0] : f32 from vector<1x1x1xf32>
    %70 = vector.broadcast %69 : f32 to vector<1x1x128xf32>
    %71 = arith.addf %63, %70 : vector<1x1x128xf32>
    %c0_39 = arith.constant 0 : index
    %c0_40 = arith.constant 0 : index
    %c0_41 = arith.constant 0 : index
    %72 = vector.load %arg8[%c0_39, %c0_40, %c0_41] : memref<1x1x128xf32, #tpu.memory_space<vmem>>, vector<1x1x128xf32>
    tpu.vector_store %arg8[%c0_39, %c0_40, %c0_41], %71 {strides = array<i32>} : memref<1x1x128xf32, #tpu.memory_space<vmem>>, vector<1x1x128xf32>,
    return
  }
  func.func @transform_0(%arg0: i32, %arg1: i32) -> (i32, i32, i32) {
    %c0_i32 = arith.constant 0 : i32
    %c0_i32_0 = arith.constant 0 : i32
    return %arg0, %c0_i32, %arg1 : i32, i32, i32
  }
  func.func @transform_1(%arg0: i32, %arg1: i32) -> (i32, i32, i32) {
    %c0_i32 = arith.constant 0 : i32
    %c0_i32_0 = arith.constant 0 : i32
    return %arg0, %c0_i32, %arg1 : i32, i32, i32
  }
  func.func @transform_2(%arg0: i32, %arg1: i32) -> (i32, i32, i32) {
    %c0_i32 = arith.constant 0 : i32
    %c0_i32_0 = arith.constant 0 : i32
    return %arg0, %c0_i32, %arg1 : i32, i32, i32
  }
  func.func @transform_3(%arg0: i32, %arg1: i32) -> (i32, i32, i32) {
    %c0_i32 = arith.constant 0 : i32
    %c0_i32_0 = arith.constant 0 : i32
    return %arg0, %c0_i32, %arg1 : i32, i32, i32
  }
  func.func @transform_4(%arg0: i32, %arg1: i32) -> (i32, i32, i32) {
    %c0_i32 = arith.constant 0 : i32
    %c0_i32_0 = arith.constant 0 : i32
    return %arg0, %c0_i32, %arg1 : i32, i32, i32
  }
  func.func @transform_5(%arg0: i32, %arg1: i32) -> (i32, i32, i32) {
    %c0_i32 = arith.constant 0 : i32
    %c0_i32_0 = arith.constant 0 : i32
    %c0_i32_1 = arith.constant 0 : i32
    return %arg0, %c0_i32, %c0_i32_0 : i32, i32, i32
  }
  func.func @transform_6(%arg0: i32, %arg1: i32) -> (i32, i32, i32) {
    %c0_i32 = arith.constant 0 : i32
    %c0_i32_0 = arith.constant 0 : i32
    %c0_i32_1 = arith.constant 0 : i32
    return %arg0, %c0_i32, %c0_i32_0 : i32, i32, i32
  }
  func.func @transform_7(%arg0: i32, %arg1: i32) -> (i32, i32, i32) {
    %c0_i32 = arith.constant 0 : i32
    %c0_i32_0 = arith.constant 0 : i32
    %c0_i32_1 = arith.constant 0 : i32
    return %arg0, %c0_i32, %c0_i32_0 : i32, i32, i32
  }
}

</mosaic_0001>

<bundles_post_ra>
// kernel: multibox_loss.2
= control target key start
LH: loop header
LB: loop body
LE: loop exit
PB: predicated region body
PF: predicated region fallthrough
CT: control target
= control target key end

     0   :  { %s428_s9 = smov 0   ;;  %s430_s10 = smov 0   ;;  %s471_s0 = inlined_call_operand.vmem [shape: f32[2,8,4], index: 0, kind: input, shape index: {}]   ;;  %s472_s1 = inlined_call_operand.vmem [shape: f32[4,128], index: 1, kind: input, shape index: {}]   ;;  %s473_s2 = inlined_call_operand.vmem [shape: f32[2,8,128], index: 2, kind: output, shape index: {}]  }
   0x1   :  { %s432_s11 = smov 0  }
   0x2 LB: > { %s24_s12 = sadd.s32 1, %s401_s10  ;;  %p341_p0 = scmp.ge.s32.totalorder %s405_s11, 1  ;;  %s405_s11 = sphi %s432_s11, %s12_s11   ;;  %s401_s10 = sphi %s430_s10, %s475_s10   ;;  %s397_s9 = sphi %s428_s9, %s474_s9  }
   0x3   : > { %p26_p1 = scmp.ge.s32.totalorder %s24_s12, 2  ;;  %p134_p2 = scmp.lt.s32.totalorder %s405_s11, 3 }
   0x5   : > { %s477_s12 = smov (%p26_p1, %s24_s12), 0  ;;  %p135_p3 = pnand %p341_p0, %p134_p2 }
   0x6   : > { %p161_p4 = scmp.lt.s32.totalorder (!%p135_p3), %s397_s9, 1  ;;  %s407_s17 = smov (!%p135_p3), 2  }
   0x7   : > { %138 = sbr.rel (%p135_p3) target bundleno = 389 (0x185), region = 28  ;;  %s410_s18 = smov (!%p135_p3), 127  }
   0xc   : > { %s479_s9 = smov (!%p161_p4, %s397_s9), 1  ;;  %v408_v1 = vmov 0   ;;  %v409_v2 = vmov 1   ;;  %v411_v5 = vmov 2   ;;  %v412_v6 = vmov 3  }
   0xd   : > { %s342_s13 = sshll.u32 %s479_s9, 3  ;;  %376 = vset.pattern.permute.xlu1 %v408_v1  ;;  %380 = vset.pattern.permute.xlu0 %v411_v5  ;;  %v177_v11 = vld [vmem:[%s472_s1] sm:$0xf] }
   0xe   : > { %s164_s16 = scalar_lea.vmem %s471_s0, %s342_s13  ;;  %378 = vset.pattern.permute.xlu2 %v411_v5  ;;  %v218_v12 = vrot.slane %v177_v11, 6  ;;  %v183_v13 = vperm.slane %v177_v11, 0  ;;  %v195_v14 = vperm.slane %v177_v11, 2  ;;  %v201_v15 = vperm.slane %v177_v11, 3  ;;  %s175_s23 = scalar_lea.vmem %s473_s2, %s342_s13 }
   0xf   : > { %v176_v0 = vld [vmem:[%s164_s16] sm:$0xff]  ;;  %v189_v16 = vperm.slane %v177_v11, 1 }
  0x10   : > { %208 = vrot.lane.b32.xlu0 %v176_v0, %s407_s17  ;;  %180 = vperm.xlu1 %376, %v176_v0   ;;  %v220_v17 = vsub.f32 %v177_v11, %v218_v12 }
  0x11   : > { %192 = vperm.xlu2 %378, %v176_v0  }
  0x12   : > { %v222_v24 = vrot.slane %v220_v17, 1 }
  0x14   : > { %v224_v27 = vmul.f32 %v222_v24, %v220_v17 }
  0x16   : > { %v230_v30 = vperm.slane %v224_v27, 2 }
  0x18   : > { %377 = vset.pattern.permute.xlu1 %v409_v2 }
  0x19   : > { %186 = vperm.xlu1 %377, %v176_v0   ;;  %379 = vset.pattern.permute.xlu2 %v412_v6 }
  0x1a   : > { %198 = vperm.xlu2 %379, %v176_v0  }
  0x6b   : > { %v193_v9 = vpop.permute.xlu2 %192 }
  0x6c   : > { %v196_v21 = vmin.f32 %v193_v9, %v195_v14 }
  0x74   : > { %v199_v18 = vpop.permute.xlu2 %198 }
  0x75   : > { %v202_v22 = vmin.f32 %v199_v18, %v201_v15 }
  0x82   : > { %v209_v3 = vpop.permute.xlu0 %208  ;;  %v181_v10 = vpop.permute.xlu1 %180 }
  0x83   : > { %v211_v4 = vsub.f32 %v176_v0, %v209_v3  ;;  %v184_v20 = vmax.f32 %v181_v10, %v183_v13 }
  0x85   : > { %213 = vrot.lane.b32.xlu0 %v211_v4, %s410_s18  ;;  %v203_v25 = vsub.f32 %v196_v21, %v184_v20 }
  0x87   : > { %v204_v28 = vmax.f32 %v203_v25, 0.0 }
  0x8b   : > { %v187_v19 = vpop.permute.xlu1 %186 }
  0x8c   : > { %v190_v23 = vmax.f32 %v187_v19, %v189_v16 }
  0x8e   : > { %v205_v26 = vsub.f32 %v202_v22, %v190_v23 }
  0x90   : > { %v206_v29 = vmax.f32 %v205_v26, 0.0 }
  0x92   : > { %v207_v32 = vmul.f32 %v206_v29, %v204_v28 }
  0xf7   : > { %v214_v7 = vpop.permute.xlu0 %213 }
  0xf8   : > { %v216_v8 = vmul.f32 %v214_v7, %v211_v4 }
  0xfa   : > { %227 = vperm.xlu0 %380, %v216_v8  }
 0x16c   : > { %v228_v31 = vpop.permute.xlu0 %227 }
 0x16d   : > { %v231_v33 = vadd.f32 %v230_v30, %v228_v31 }
 0x16f   : > { %v232_v34 = vsub.f32 %v231_v33, %v207_v32 }
 0x171   : > { %381 = vrcp.f32 %v232_v34  ;;  %v244_v38 = vand.u32 2147483648, %v232_v34  ;;  %v242_v40 = vand.u32 2147483647, %v232_v34  ;;  %vm238_vm1 = vweird.f32 %v232_v34 }
 0x173   : > { %v245_v42 = vor.u32 1.1754944e-38, %v244_v38  ;;  %vm243_vm3 = vcmp.eq.f32.partialorder %v242_v40, 8.507059e+37 }
 0x177   : > { %v382_v35 = vpop.eup %381 }
 0x178   : > { %v234_v36 = vmul.f32 %v382_v35, %v232_v34  ;;  %vm239_vm0 = vweird.f32 %v382_v35 }
 0x179   : > { %vm240_vm2 = vmor %vm238_vm1, %vm239_vm0 }
 0x17a   : > { %v235_v37 = vsub.f32 1.0, %v234_v36 }
 0x17c   : > { %v236_v39 = vmul.f32 %v382_v35, %v235_v37 }
 0x17e   : > { %v237_v41 = vadd.f32 %v382_v35, %v236_v39 }
 0x180   : > { %v241_v43 = vsel %vm240_vm2, %v382_v35, %v237_v41 }
 0x181   : > { %v246_v44 = vsel %vm243_vm3, %v245_v42, %v241_v43 }
 0x182   : > { %v247_v45 = vmul.f32 %v246_v44, %v207_v32 }
 0x184   : > { %248 = vst [vmem:[%s175_s23] sm:$0xff] %v247_v45 }
 0x185 PF: > { %s12_s11 = sadd.s32 1, %s405_s11   ;;  %s474_s9 = smov %s401_s10 }
 0x186   : > { %p9_p5 = scmp.ge.s32.totalorder %s12_s11, 4   ;;  %s475_s10 = smov %s477_s12 }
 0x188   :  { %11 = sbr.rel (!%p9_p5) target bundleno = 2 (0x2), region = 61 }

// kernel: multibox_loss.3
= control target key start
LH: loop header
LB: loop body
LE: loop exit
PB: predicated region body
PF: predicated region fallthrough
CT: control target
= control target key end

     0   :  { %s813_s24 = smov 0   ;;  %s815_s25 = smov 0   ;;  %s890_s0 = inlined_call_operand.vmem [shape: f32[2,8,128], index: 0, kind: input, shape index: {}]   ;;  %s891_s1 = inlined_call_operand.vmem [shape: s32[2,1,128], index: 1, kind: input, shape index: {}]   ;;  %s892_s2 = inlined_call_operand.vmem [shape: f32[2,4,128], index: 2, kind: input, shape index: {}]   ;;  %s893_s3 = inlined_call_operand.vmem [shape: f32[2,4,128], index: 3, kind: input, shape index: {}]   ;;  %s894_s4 = inlined_call_operand.vmem [shape: f32[2,1,128], index: 4, kind: output, shape index: {0}]   ;;  %s895_s5 = inlined_call_operand.vmem [shape: f32[2,1,128], index: 5, kind: output, shape index: {1}]   ;;  %s896_s6 = inlined_call_operand.vmem [shape: f32[2,1,128], index: 6, kind: output, shape index: {2}]   ;;  %s897_s7 = inlined_call_operand.vmem [shape: f32[2,1,128], index: 7, kind: output, shape index: {3}]  }
   0x1   :  { %s817_s26 = smov 0  }
   0x2 LB: > { %s30_s27 = sadd.s32 1, %s765_s25  ;;  %p703_p0 = scmp.ge.s32.totalorder %s769_s26, 1  ;;  %s769_s26 = sphi %s817_s26, %s18_s26   ;;  %s765_s25 = sphi %s815_s25, %s899_s25   ;;  %s761_s24 = sphi %s813_s24, %s898_s24  }
   0x3   : > { %p32_p1 = scmp.ge.s32.totalorder %s30_s27, 2  ;;  %p303_p2 = scmp.lt.s32.totalorder %s769_s26, 3 }
   0x5   : > { %s901_s27 = smov (%p32_p1, %s30_s27), 0  ;;  %p304_p3 = pnand %p703_p0, %p303_p2 }
   0x6   : > { %p367_p4 = scmp.lt.s32.totalorder (!%p304_p3), %s761_s24, 1 }
   0x7   : > { %307 = sbr.rel (%p304_p3) target bundleno = 258 (0x102), region = 36 }
   0xc   : > { %s903_s24 = smov (!%p367_p4, %s761_s24), 1  ;;  %v436_v6 = vlaneseq  ;;  %v771_v15 = vmov 0.0   ;;  %vm500_vm2 = vcmask 1043456   ;;  %vm772_vm4 = vmmov 1  }
   0xd   : > { %s704_s28 = sshll.u32 %s903_s24, 3  ;;  %s705_s9 = sshll.u32 %s903_s24, 2  ;;  %vm463_vm7 = vcmask 1040384  }
   0xe   : > { %s373_s8 = scalar_lea.vmem %s890_s0, %s704_s28  ;;  %s379_s12 = scalar_lea.vmem %s891_s1, %s903_s24  ;;  %v437_v10 = vshrl.u32 %v436_v6, 7  ;;  %v452_v35 = vand.u32 127, %v436_v6 }
   0xf   : > { %v416_v0 = vld [vmem:[%s373_s8] sm:$0xff]  ;;  %s386_s15 = scalar_lea.vmem %s892_s2, %s705_s9  ;;  %s393_s18 = scalar_lea.vmem %s893_s3, %s705_s9 }
  0x10   : > { %v418_v1 = vrot.slane %v416_v0, 4  ;;  %v417_v8 = vld [vmem:[%s379_s12] sm:$0x1]  ;;  %vm456_vm3 = vcmp.lt.s32.totalorder %v452_v35, 64  ;;  %s399_s21 = scalar_lea.vmem %s894_s4, %s903_s24  ;;  %s858_s28 = scalar_lea.vmem %s895_s5, %s903_s24 }
  0x11   : > { %v742_v11 = vld [vmem:[%s379_s12] ss:$0 sm:$0xff]  ;;  %vm448_vm0 = vcmp.ne.s32.totalorder %v417_v8, 0  ;;  %413 = vst [vmem:[%s858_s28] sm:$0x1] %v771_v15  ;;  %s865_s8 = scalar_lea.vmem %s897_s7, %s903_s24  ;;  %s871_s11 = scalar_lea.vmem %s896_s6, %s903_s24 }
  0x12   : > { %v419_v2 = vmax.f32 %v416_v0, %v418_v1  ;;  %v491_v12 = vld [vmem:[%s386_s15] sm:$0xf]  ;;  %v707_v16 = vsel %vm448_vm0, 1.0, %v771_v15  ;;  %vm439_vm1 = vcmp.eq.s32.totalorder %v437_v10, %v742_v11  ;;  %vm457_vm5 = vmxor %vm448_vm0, %vm772_vm4  ;;  %415 = vst [vmem:[%s865_s8] sm:$0x1] %v771_v15 }
  0x13   : > { %v492_v13 = vld [vmem:[%s393_s18] sm:$0xf]  ;;  %v497_v18 = vperm.slane %v707_v16, 0  ;;  %v440_v20 = vsel %vm439_vm1, %v416_v0, 0.0  ;;  %vm458_vm6 = vmand %vm456_vm3, %vm457_vm5  ;;  %v478_v44 = vsel %vm463_vm7, %v707_v16, 0.0  ;;  %414 = vst [vmem:[%s871_s11] sm:$0x1] %v771_v15 }
  0x14   : > { %v420_v3 = vrot.slane %v419_v2, 2  ;;  %v493_v17 = vsub.f32 %v491_v12, %v492_v13  ;;  %v441_v24 = vrot.slane %v440_v20, 4 }
  0x16   : > { %v421_v4 = vmax.f32 %v419_v2, %v420_v3  ;;  %v494_v19 = vand.u32 2147483647, %v493_v17  ;;  %v442_v27 = vadd.f32 %v441_v24, %v440_v20 }
  0x18   : > { %v422_v5 = vrot.slane %v421_v4, 1  ;;  %v499_v21 = vmul.f32 %v497_v18, %v494_v19  ;;  %v443_v30 = vrot.slane %v442_v27, 2  ;;  %v461_v2 = vld [vmem:[%s858_s28] sm:$0x1] }
  0x1a   : > { %v423_v7 = vmax.f32 %v421_v4, %v422_v5  ;;  %v501_v22 = vsel %vm500_vm2, %v499_v21, 0.0  ;;  %v444_v33 = vadd.f32 %v443_v30, %v442_v27  ;;  %v477_v5 = vld [vmem:[%s865_s8] sm:$0x1] }
  0x1b   : > { %502 = vadd.xlane.f32.xlu1 %v501_v22  ;;  %v495_v6 = vld [vmem:[%s871_s11] sm:$0x1] }
  0x1c   : > { %v424_v9 = vsub.f32 %v416_v0, %v423_v7  ;;  %v445_v34 = vrot.slane %v444_v33, 1 }
  0x1e   : > { %v425_v14 = vmul.f32 1.442695, %v424_v9  ;;  %v446_v38 = vadd.f32 %v445_v34, %v444_v33 }
  0x20   : > { %743 = vpow2.f32 %v425_v14 }
  0x26   : > { %v744_v23 = vpop.eup %743 }
  0x27   : > { %v427_v25 = vrot.slane %v744_v23, 4 }
  0x29   : > { %v428_v26 = vadd.f32 %v744_v23, %v427_v25 }
  0x2b   : > { %v429_v28 = vrot.slane %v428_v26, 2 }
  0x2d   : > { %v430_v29 = vadd.f32 %v429_v28, %v428_v26 }
  0x2f   : > { %v431_v31 = vrot.slane %v430_v29, 1 }
  0x31   : > { %v432_v32 = vadd.f32 %v431_v31, %v430_v29 }
  0x33   : > { %745 = vlog2.f32 %v432_v32 }
  0x39   : > { %v746_v36 = vpop.eup %745 }
  0x3a   : > { %v434_v37 = vmul.f32 0.6931472, %v746_v36 }
  0x3c   : > { %v435_v39 = vadd.f32 %v434_v37, %v423_v7 }
  0x3e   : > { %v447_v40 = vsub.f32 %v435_v39, %v446_v38 }
  0x40   : > { %v462_v41 = vmul.f32 %v707_v16, %v447_v40  ;;  %v459_v42 = vsel %vm458_vm6, %v447_v40, 0.0 }
  0x41   : > { %460 = vst [vmem:[%s399_s21] sm:$0x1] %v459_v42 }
  0x42   : > { %v464_v43 = vsel %vm463_vm7, %v462_v41, 0.0 }
  0x43   : > { %465 = vadd.xlane.f32.xlu0 %v464_v43 }
  0x4b   : > { %479 = vadd.xlane.f32.xlu0 %v478_v44 }
  0x8e   : > { %v503_v45 = vpop.xlane.xlu1 %502 }
  0x8f   : > { %v504_v47 = vrot.slane %v503_v45, 4 }
  0x91   : > { %v505_v50 = vadd.f32 %v504_v47, %v503_v45 }
  0x93   : > { %v506_v53 = vrot.slane %v505_v50, 2 }
  0x95   : > { %v507_v59 = vadd.f32 %v506_v53, %v505_v50 }
  0x97   : > { %v508_v62 = vrot.slane %v507_v59, 1 }
  0x99   : > { %v509_v1 = vadd.f32 %v508_v62, %v507_v59 }
  0xb6   : > { %v466_v46 = vpop.xlane.xlu0 %465 }
  0xb7   : > { %v467_v48 = vrot.slane %v466_v46, 4 }
  0xb9   : > { %v468_v49 = vadd.f32 %v467_v48, %v466_v46 }
  0xbb   : > { %v469_v51 = vrot.slane %v468_v49, 2 }
  0xbd   : > { %v470_v52 = vadd.f32 %v469_v51, %v468_v49 }
  0xbe   : > { %v480_v54 = vpop.xlane.xlu0 %479 }
  0xbf   : > { %v481_v55 = vrot.slane %v480_v54, 4  ;;  %v471_v56 = vrot.slane %v470_v52, 1 }
  0xc1   : > { %v482_v57 = vadd.f32 %v481_v55, %v480_v54  ;;  %v472_v58 = vadd.f32 %v471_v56, %v470_v52 }
  0xc3   : > { %v483_v60 = vrot.slane %v482_v57, 2  ;;  %710 = vpush %v472_v58 }
  0xc5   : > { %v484_v61 = vadd.f32 %v483_v60, %v482_v57 }
  0xc7   : > { %v485_v63 = vrot.slane %v484_v61, 1 }
  0xc9   : > { %v486_v0 = vadd.f32 %v485_v63, %v484_v61 }
  0xcb   : > { %712 = vpush %v486_v0 }
  0xcc   : > { %714 = vpush %v509_v1 }
  0xf4   : > { %s711_s24 = spop %710 }
  0xf5   : > { %v474_v3 = vstv %s711_s24 }
  0xf6   : > { %v475_v4 = vadd.f32 %v474_v3, %v461_v2 }
  0xf8   : > { %476 = vst [vmem:[%s858_s28] sm:$0x1] %v475_v4 }
  0xfc   : > { %s713_s12 = spop %712 }
  0xfd   : > { %v488_v7 = vstv %s713_s12  ;;  %s715_s13 = spop %714 }
  0xfe   : > { %v489_v8 = vadd.f32 %v488_v7, %v477_v5  ;;  %v511_v9 = vstv %s715_s13 }
  0xff   : > { %v512_v10 = vadd.f32 %v511_v9, %v495_v6 }
 0x100   : > { %490 = vst [vmem:[%s865_s8] sm:$0x1] %v489_v8 }
 0x101   : > { %513 = vst [vmem:[%s871_s11] sm:$0x1] %v512_v10 }
 0x102 PF: > { %s18_s26 = sadd.s32 1, %s769_s26   ;;  %s898_s24 = smov %s765_s25 }
 0x103   : > { %p15_p5 = scmp.ge.s32.totalorder %s18_s26, 4   ;;  %s899_s25 = smov %s901_s27 }
 0x105   :  { %17 = sbr.rel (!%p15_p5) target bundleno = 2 (0x2), region = 115 }

</bundles_post_ra>
